<compile_context>
chip_gen: v6e
topology: v6e:2x2x1
jax: 0.10.0
libtpu: 0.0.40
codegen_flags: <defaults>
</compile_context>

<pallas_src>
import functools

import jax
import jax.numpy as jnp
from jax.experimental import pallas as pl
from jax.experimental.pallas import tpu as pltpu


def _conloss_kernel(x_ref, sqc_ref, sqr_ref, cmod_ref,
                    k_ref, mlpp_ref,
                    denom_acc, pos_acc, *,
                    tm, tn, num_smp, inv_two_t2, inv_pos, use_bf16_matmul):
    """One (TM, TN) tile of the ConLoss hot path.

    x_ref    : (N, D)    all features, resident across every grid step
    sqc_ref  : (1, TN)   hoisted column squared norms
    sqr_ref  : (TM, 1)   hoisted row squared norms (same array as sqc -> exact diag)
    cmod_ref : (1, TN)   column_index % num_smp (int32, hoisted)
    k_ref    : (TM, TN)  Gaussian kernel tile output
    mlpp_ref : (1, 1, TM) lane-dense per-row statistic (written at last column step)
    denom_acc, pos_acc : (1, TM) VMEM accumulators over the column axis
    """
    i = pl.program_id(0)
    j = pl.program_id(1)
    n_col_steps = pl.num_programs(1)

    row0 = pl.multiple_of(i * tm, tm)
    col0 = pl.multiple_of(j * tn, tn)

    # Row / column feature tiles sliced out of the resident block (no extra DMA).
    xr = x_ref[pl.ds(row0, tm), :]                        # (TM, D)
    xc = x_ref[pl.ds(col0, tn), :]                        # (TN, D)
    if use_bf16_matmul:
        # Precision-gated fast MXU path (native bf16 on v6e/v7x).
        xr = xr.astype(jnp.bfloat16)
        xc = xc.astype(jnp.bfloat16)

    aa = sqr_ref[...]                                     # (TM, 1) hoisted row norms
    bb = sqc_ref[...]                                     # (1, TN) hoisted col norms
    ab = jax.lax.dot_general(                             # MXU; contract last dims
        xr, xc, (((1,), (1,)), ((), ())),
        preferred_element_type=jnp.float32)               # (TM, TN)
    # aa_i == bb_i bit-identically (same hoisted sq), so the diagonal distance
    # cancels exactly; the clamp only guards residual f32 cancellation.
    dist = jnp.maximum(aa + bb - 2.0 * ab, 0.0)

    # Gaussian kernel tile and logits.  (2x exp per element is the EUP floor.)
    k = jnp.exp(dist * (-inv_two_t2))
    k_ref[...] = k
    exp_k = jnp.exp(k)

    # Masks from global row/col indices via (TM,1) vs (1,TN) broadcasts only.
    row_ids = row0 + jax.lax.broadcasted_iota(jnp.int32, (tm, 1), 0)
    col_ids = col0 + jax.lax.broadcasted_iota(jnp.int32, (1, tn), 1)
    not_diag = row_ids != col_ids
    pos_mask = jnp.logical_and((row_ids % num_smp) == cmod_ref[...], not_diag)

    # Per-row partial sums reduced on the MXU so they land lane-dense as (1, TM)
    # (no XLU cross-lane reduce, no lane-1 masked stores).  The full (TM, TN)
    # log_prob / masked-multiply stage of the reference is gone:
    #     mlpp_i = log(denom_i) - possum_i * inv_pos.
    ones_row = jnp.ones((1, tn), jnp.float32)
    denom_blk = jax.lax.dot_general(
        ones_row, jnp.where(not_diag, exp_k, 0.0), (((1,), (1,)), ((), ())),
        preferred_element_type=jnp.float32)               # (1, TM)
    pos_blk = jax.lax.dot_general(
        ones_row, jnp.where(pos_mask, k, 0.0), (((1,), (1,)), ((), ())),
        preferred_element_type=jnp.float32)               # (1, TM)

    @pl.when(j == 0)
    def _():
        denom_acc[...] = jnp.zeros_like(denom_acc)
        pos_acc[...] = jnp.zeros_like(pos_acc)

    denom_acc[...] += denom_blk
    pos_acc[...] += pos_blk

    @pl.when(j == n_col_steps - 1)
    def _():
        mlpp_ref[0] = jnp.log(denom_acc[...]) - inv_pos * pos_acc[...]


def _pick_tiles(n):
    """Row tile TM (<=256; prefer >=4 row steps so megacore/pipelining have work)
    and lane-aligned column tile TN (512 preferred); both must divide N."""
    tm = None
    for cand in (256, 128, 64, 32, 16, 8):
        if n % cand == 0 and n // cand >= 4:
            tm = cand
            break
    if tm is None:
        for cand in (256, 128, 64, 32, 16, 8):
            if n % cand == 0:
                tm = cand
                break
    assert tm is not None, "N (= num_view * num_smp) must be a multiple of 8"
    tn = n
    for cand in (512, 256, 128):
        if n % cand == 0:
            tn = cand
            break
    return tm, tn


def conloss_kernel_call(features_cat, *, num_view, num_smp, gauss_t,
                        tm=None, tn=None, use_bf16_matmul=False):
    """Run the Pallas kernel over the (row-tile, column-tile) grid.

    Returns (K [N, N] f32, mlpp [N] f32)."""
    n, d = features_cat.shape
    auto_tm, auto_tn = _pick_tiles(n)
    tm = auto_tm if tm is None else tm
    tn = auto_tn if tn is None else tn
    assert n % tm == 0 and n % tn == 0
    assert num_view >= 2, "num_view < 2 -> mask.sum(1) == 0 (divide by zero)"

    x = features_cat.astype(jnp.float32)
    # Hoisted per-step invariants (single sq array feeds both orientations so
    # the in-kernel diagonal cancellation is exact).
    sq = jnp.sum(x * x, axis=1)                              # [N]
    sq_col = sq.reshape(1, n)
    sq_row = sq.reshape(n, 1)
    col_mod = (jnp.arange(n, dtype=jnp.int32) % num_smp).reshape(1, n)

    kern = functools.partial(
        _conloss_kernel,
        tm=tm, tn=tn, num_smp=num_smp,
        inv_two_t2=1.0 / (2.0 * gauss_t * gauss_t),
        inv_pos=1.0 / float(num_view - 1),
        use_bf16_matmul=use_bf16_matmul)

    # VMEM footprint: resident features + double-buffered K tile + row/col
    # feature slices + hoisted aux rows + accumulators.  Column tiling keeps it
    # small, so a <=48 MiB cap leaves headroom on every generation (incl. v7x).
    footprint = (n * d * 4 + 2 * tm * tn * 4 + (tm + tn) * d * 4
                 + 4 * tn * 4 + 8 * tm * 4)
    vmem_limit = int(min(48 * 1024 * 1024, max(32 * 1024 * 1024, 6 * footprint)))

    k_mat, mlpp3d = pl.pallas_call(
        kern,
        out_shape=(
            jax.ShapeDtypeStruct((n, n), jnp.float32),
            jax.ShapeDtypeStruct((n // tm, 1, tm), jnp.float32),
        ),
        grid_spec=pltpu.PrefetchScalarGridSpec(
            num_scalar_prefetch=0,
            grid=(n // tm, n // tn),
            in_specs=[
                pl.BlockSpec((n, d), lambda i, j: (0, 0)),    # resident features
                pl.BlockSpec((1, tn), lambda i, j: (0, j)),   # column squared norms
                pl.BlockSpec((tm, 1), lambda i, j: (i, 0)),   # row squared norms
                pl.BlockSpec((1, tn), lambda i, j: (0, j)),   # col index % num_smp
            ],
            out_specs=[
                pl.BlockSpec((tm, tn), lambda i, j: (i, j)),     # K tile
                pl.BlockSpec((1, 1, tm), lambda i, j: (i, 0, 0)),  # lane-dense mlpp
            ],
            scratch_shapes=[
                pltpu.VMEM((1, tm), jnp.float32),   # softmax denominator accumulator
                pltpu.VMEM((1, tm), jnp.float32),   # positive-pair K-sum accumulator
            ],
        ),
        compiler_params=pltpu.CompilerParams(
            dimension_semantics=("parallel", "arbitrary"),
            vmem_limit_bytes=vmem_limit),
    )(x, sq_col, sq_row, col_mod)

    return k_mat, mlpp3d.reshape(n)


def conloss_forward(features_list, *, kernel_options, num_class=10,
                    use_bf16_matmul=False):
    """Full ConLoss.forward.  Hot path (K + contrastive stats) in Pallas;
    eigendecomposition / trace glue in plain JAX."""
    assert kernel_options["type"] == "Gaussian"
    # TODO(synk): only the Gaussian kernel branch is implemented in Pallas;
    # Linear/Polynomial/Sigmoid/Cauchy branches are not translated.
    num_view = len(features_list)
    num_smp = features_list[0].shape[0]
    x = jnp.concatenate(features_list, axis=0).astype(jnp.float32)   # [N, D]

    K, mlpp = conloss_kernel_call(
        x, num_view=num_view, num_smp=num_smp,
        gauss_t=float(kernel_options["t"]),
        use_bf16_matmul=use_bf16_matmul)

    loss_con = jnp.mean(mlpp)

    # kernels[:, :, i] = K[i*ns:(i+1)*ns, i*ns:(i+1)*ns]; kernel = mean over
    # views.  Single reshape + fancy-index gather instead of num_view slices.
    K4 = K.reshape(num_view, num_smp, num_view, num_smp)
    view_idx = jnp.arange(num_view)
    diag_blocks = K4[view_idx, :, view_idx, :]            # [nv, ns, ns]
    kern_avg = jnp.mean(diag_blocks, axis=0)              # [ns, ns], symmetric

    # torch.eig + descending sort + top num_class eigenvectors.  Gaussian
    # kern_avg is symmetric -> eigh (ascending), take last num_class reversed.
    # (Eigenvector sign / degenerate ordering may differ from torch.)
    _, vecs = jnp.linalg.eigh(kern_avg)
    H = vecs[:, ::-1][:, :num_class]                      # [ns, num_class]

    loss_extra = (jnp.trace(kern_avg) -
                  jnp.trace(H.T @ kern_avg @ H)) / num_smp

    # F.normalize(H): row-wise L2 with eps = 1e-12.
    H_norm = H / jnp.maximum(
        jnp.linalg.norm(H, axis=1, keepdims=True), 1e-12)

    return loss_con, loss_extra, K, H_norm


if __name__ == "__main__":
    # Deterministic synthetic inputs (module has no learnable weights).
    num_view, num_smp, feat_dim = 2, 64, 32
    key = jax.random.PRNGKey(0)
    keys = jax.random.split(key, num_view)
    features = [jax.random.normal(k, (num_smp, feat_dim), dtype=jnp.float32)
                for k in keys]

    kernel_options = {"type": "Gaussian", "t": 1.0}
    loss_con, loss_extra, K, H = conloss_forward(
        features, kernel_options=kernel_options, num_class=10)

    jax.block_until_ready((loss_con, loss_extra, K, H))
    print("KERNEL_OK")
</pallas_src>

<mosaic_0001>
module attributes {stable_mosaic.version = 11 : i64} {
  func.func @_conloss_kernel(%arg0: i32, %arg1: i32, %arg2: memref<128x32xf32, #tpu.memory_space<vmem>>, %arg3: memref<1x128xf32, #tpu.memory_space<vmem>>, %arg4: memref<32x1xf32, #tpu.memory_space<vmem>>, %arg5: memref<1x128xi32, #tpu.memory_space<vmem>>, %arg6: memref<32x128xf32, #tpu.memory_space<vmem>>, %arg7: memref<1x1x32xf32, #tpu.memory_space<vmem>>, %arg8: memref<1x32xf32, #tpu.memory_space<vmem>>, %arg9: memref<1x32xf32, #tpu.memory_space<vmem>>) attributes {dimension_semantics = [#tpu.dimension_semantics<parallel>, #tpu.dimension_semantics<arbitrary>], iteration_bounds = array<i64: 4, 1>, scalar_prefetch = 0 : i64, scratch_operands = 2 : i64, tpu.core_type = #tpu.core_type<tc>, window_params = [{pipeline_mode = #tpu.pipeline_mode<synchronous>, transform_indices = @transform_0, window_bounds = array<i64: 128, 32>}, {transform_indices = @transform_1, window_bounds = array<i64: 1, 128>}, {transform_indices = @transform_2, window_bounds = array<i64: 32, 1>}, {transform_indices = @transform_3, window_bounds = array<i64: 1, 128>}, {transform_indices = @transform_4, window_bounds = array<i64: 32, 128>}, {transform_indices = @transform_5, window_bounds = array<i64: 1, 1, 32>}]} {
    %c32_i32 = arith.constant 32 : i32
    %0 = arith.muli %arg0, %c32_i32 : i32
    %1 = tpu.assume_multiple %0, 32 : i32
    %c128_i32 = arith.constant 128 : i32
    %2 = arith.muli %arg1, %c128_i32 : i32
    %3 = tpu.assume_multiple %2, 128 : i32
    %4 = arith.index_cast %1 : i32 to index
    %c0 = arith.constant 0 : index
    %5 = vector.load %arg2[%4, %c0] : memref<128x32xf32, #tpu.memory_space<vmem>>, vector<32x32xf32>
    %6 = arith.index_cast %3 : i32 to index
    %c0_0 = arith.constant 0 : index
    %7 = vector.load %arg2[%6, %c0_0] : memref<128x32xf32, #tpu.memory_space<vmem>>, vector<128x32xf32>
    %c0_1 = arith.constant 0 : index
    %c0_2 = arith.constant 0 : index
    %8 = vector.load %arg4[%c0_1, %c0_2] : memref<32x1xf32, #tpu.memory_space<vmem>>, vector<32x1xf32>
    %c0_3 = arith.constant 0 : index
    %c0_4 = arith.constant 0 : index
    %9 = vector.load %arg3[%c0_3, %c0_4] : memref<1x128xf32, #tpu.memory_space<vmem>>, vector<1x128xf32>
    %cst = arith.constant dense<0.000000e+00> : vector<32x128xf32>
    %10 = tpu.matmul %5, %7, %cst {dimension_numbers = #tpu.dot_dimension_numbers<[1], [1], [0], [0], [0, 0, 1, 0], [], []>} : vector<32x32xf32>, vector<128x32xf32>, vector<32x128xf32> -> vector<32x128xf32>
    %11 = vector.broadcast %8 : vector<32x1xf32> to vector<32x128xf32>
    %12 = vector.broadcast %9 : vector<1x128xf32> to vector<32x128xf32>
    %13 = arith.addf %11, %12 : vector<32x128xf32>
    %cst_5 = arith.constant 2.000000e+00 : f32
    %14 = vector.broadcast %cst_5 : f32 to vector<32x128xf32>
    %15 = arith.mulf %14, %10 : vector<32x128xf32>
    %16 = arith.subf %13, %15 : vector<32x128xf32>
    %cst_6 = arith.constant 0.000000e+00 : f32
    %17 = vector.broadcast %cst_6 : f32 to vector<32x128xf32>
    %18 = arith.maximumf %16, %17 : vector<32x128xf32>
    %cst_7 = arith.constant -5.000000e-01 : f32
    %19 = vector.broadcast %cst_7 : f32 to vector<32x128xf32>
    %20 = arith.mulf %18, %19 : vector<32x128xf32>
    %21 = math.exp %20 : vector<32x128xf32>
    %c0_8 = arith.constant 0 : index
    %c0_9 = arith.constant 0 : index
    %22 = vector.load %arg6[%c0_8, %c0_9] : memref<32x128xf32, #tpu.memory_space<vmem>>, vector<32x128xf32>
    tpu.vector_store %arg6[%c0_8, %c0_9], %21 {strides = array<i32>} : memref<32x128xf32, #tpu.memory_space<vmem>>, vector<32x128xf32>,
    %23 = math.exp %21 : vector<32x128xf32>
    %24 = tpu.iota {dimensions = array<i32: 0>} : vector<32x1xi32>
    %25 = vector.broadcast %1 : i32 to vector<32x1xi32>
    %26 = arith.addi %25, %24 : vector<32x1xi32>
    %27 = tpu.iota {dimensions = array<i32: 1>} : vector<1x128xi32>
    %28 = vector.broadcast %3 : i32 to vector<1x128xi32>
    %29 = arith.addi %28, %27 : vector<1x128xi32>
    %30 = vector.broadcast %26 : vector<32x1xi32> to vector<32x128xi32>
    %31 = vector.broadcast %29 : vector<1x128xi32> to vector<32x128xi32>
    %32 = arith.cmpi ne, %30, %31 : vector<32x128xi32>
    %c64_i32 = arith.constant 64 : i32
    %c0_i32 = arith.constant 0 : i32
    %33 = arith.cmpi eq, %c64_i32, %c0_i32 : i32
    %c1_i32 = arith.constant 1 : i32
    %34 = arith.select %33, %c1_i32, %c64_i32 : i32
    %35 = vector.broadcast %34 : i32 to vector<32x1xi32>
    %36 = arith.remsi %26, %35 : vector<32x1xi32>
    %c0_i32_10 = arith.constant 0 : i32
    %37 = vector.broadcast %c0_i32_10 : i32 to vector<32x1xi32>
    %38 = arith.cmpi ne, %36, %37 : vector<32x1xi32>
    %c0_i32_11 = arith.constant 0 : i32
    %39 = vector.broadcast %c0_i32_11 : i32 to vector<32x1xi32>
    %40 = arith.cmpi slt, %36, %39 : vector<32x1xi32>
    %c0_i32_12 = arith.constant 0 : i32
    %41 = arith.cmpi slt, %34, %c0_i32_12 : i32
    %42 = vector.broadcast %41 : i1 to vector<32x1xi1>
    %43 = vector.broadcast %42 : vector<32x1xi1> to vector<32x1xi1>
    %44 = arith.xori %40, %43 : vector<32x1xi1>
    %45 = arith.andi %44, %38 : vector<32x1xi1>
    %46 = vector.broadcast %34 : i32 to vector<32x1xi32>
    %47 = arith.addi %36, %46 : vector<32x1xi32>
    %48 = arith.select %45, %47, %36 : vector<32x1xi1>, vector<32x1xi32>
    %c0_13 = arith.constant 0 : index
    %c0_14 = arith.constant 0 : index
    %49 = vector.load %arg5[%c0_13, %c0_14] : memref<1x128xi32, #tpu.memory_space<vmem>>, vector<1x128xi32>
    %50 = vector.broadcast %48 : vector<32x1xi32> to vector<32x128xi32>
    %51 = vector.broadcast %49 : vector<1x128xi32> to vector<32x128xi32>
    %52 = arith.cmpi eq, %50, %51 : vector<32x128xi32>
    %53 = arith.andi %52, %32 : vector<32x128xi1>
    %cst_15 = arith.constant 1.000000e+00 : f32
    %54 = vector.broadcast %cst_15 : f32 to vector<1x128xf32>
    %cst_16 = arith.constant 0.000000e+00 : f32
    %55 = vector.broadcast %cst_16 : f32 to vector<32x128xf32>
    %56 = arith.select %32, %23, %55 : vector<32x128xi1>, vector<32x128xf32>
    %cst_17 = arith.constant dense<0.000000e+00> : vector<1x32xf32>
    %57 = tpu.matmul %54, %56, %cst_17 {dimension_numbers = #tpu.dot_dimension_numbers<[1], [1], [0], [0], [0, 0, 1, 0], [], []>} : vector<1x128xf32>, vector<32x128xf32>, vector<1x32xf32> -> vector<1x32xf32>
    %cst_18 = arith.constant 0.000000e+00 : f32
    %58 = vector.broadcast %cst_18 : f32 to vector<32x128xf32>
    %59 = arith.select %53, %21, %58 : vector<32x128xi1>, vector<32x128xf32>
    %cst_19 = arith.constant dense<0.000000e+00> : vector<1x32xf32>
    %60 = tpu.matmul %54, %59, %cst_19 {dimension_numbers = #tpu.dot_dimension_numbers<[1], [1], [0], [0], [0, 0, 1, 0], [], []>} : vector<1x128xf32>, vector<32x128xf32>, vector<1x32xf32> -> vector<1x32xf32>
    %c0_i32_20 = arith.constant 0 : i32
    %61 = arith.cmpi eq, %arg1, %c0_i32_20 : i32
    %62 = arith.extui %61 : i1 to i32
    %c0_i32_21 = arith.constant 0 : i32
    %63 = arith.cmpi ne, %62, %c0_i32_21 : i32
    scf.if %63 {
      %cst_32 = arith.constant 0.000000e+00 : f32
      %73 = vector.broadcast %cst_32 : f32 to vector<1x32xf32>
      %c0_33 = arith.constant 0 : index
      %c0_34 = arith.constant 0 : index
      %74 = vector.load %arg8[%c0_33, %c0_34] : memref<1x32xf32, #tpu.memory_space<vmem>>, vector<1x32xf32>
      tpu.vector_store %arg8[%c0_33, %c0_34], %73 {strides = array<i32>} : memref<1x32xf32, #tpu.memory_space<vmem>>, vector<1x32xf32>,
      %cst_35 = arith.constant 0.000000e+00 : f32
      %75 = vector.broadcast %cst_35 : f32 to vector<1x32xf32>
      %c0_36 = arith.constant 0 : index
      %c0_37 = arith.constant 0 : index
      %76 = vector.load %arg9[%c0_36, %c0_37] : memref<1x32xf32, #tpu.memory_space<vmem>>, vector<1x32xf32>
      tpu.vector_store %arg9[%c0_36, %c0_37], %75 {strides = array<i32>} : memref<1x32xf32, #tpu.memory_space<vmem>>, vector<1x32xf32>,
    } else {
    }
    %c0_22 = arith.constant 0 : index
    %c0_23 = arith.constant 0 : index
    %64 = vector.load %arg8[%c0_22, %c0_23] : memref<1x32xf32, #tpu.memory_space<vmem>>, vector<1x32xf32>
    %65 = arith.addf %64, %57 : vector<1x32xf32>
    %c0_24 = arith.constant 0 : index
    %c0_25 = arith.constant 0 : index
    %66 = vector.load %arg8[%c0_24, %c0_25] : memref<1x32xf32, #tpu.memory_space<vmem>>, vector<1x32xf32>
    tpu.vector_store %arg8[%c0_24, %c0_25], %65 {strides = array<i32>} : memref<1x32xf32, #tpu.memory_space<vmem>>, vector<1x32xf32>,
    %c0_26 = arith.constant 0 : index
    %c0_27 = arith.constant 0 : index
    %67 = vector.load %arg9[%c0_26, %c0_27] : memref<1x32xf32, #tpu.memory_space<vmem>>, vector<1x32xf32>
    %68 = arith.addf %67, %60 : vector<1x32xf32>
    %c0_28 = arith.constant 0 : index
    %c0_29 = arith.constant 0 : index
    %69 = vector.load %arg9[%c0_28, %c0_29] : memref<1x32xf32, #tpu.memory_space<vmem>>, vector<1x32xf32>
    tpu.vector_store %arg9[%c0_28, %c0_29], %68 {strides = array<i32>} : memref<1x32xf32, #tpu.memory_space<vmem>>, vector<1x32xf32>,
    %c0_i32_30 = arith.constant 0 : i32
    %70 = arith.cmpi eq, %arg1, %c0_i32_30 : i32
    %71 = arith.extui %70 : i1 to i32
    %c0_i32_31 = arith.constant 0 : i32
    %72 = arith.cmpi ne, %71, %c0_i32_31 : i32
    scf.if %72 {
      %c0_32 = arith.constant 0 : index
      %c0_33 = arith.constant 0 : index
      %73 = vector.load %arg8[%c0_32, %c0_33] : memref<1x32xf32, #tpu.memory_space<vmem>>, vector<1x32xf32>
      %74 = math.log %73 : vector<1x32xf32>
      %c0_34 = arith.constant 0 : index
      %c0_35 = arith.constant 0 : index
      %75 = vector.load %arg9[%c0_34, %c0_35] : memref<1x32xf32, #tpu.memory_space<vmem>>, vector<1x32xf32>
      %cst_36 = arith.constant 1.000000e+00 : f32
      %76 = vector.broadcast %cst_36 : f32 to vector<1x32xf32>
      %77 = arith.mulf %76, %75 : vector<1x32xf32>
      %78 = arith.subf %74, %77 : vector<1x32xf32>
      %c0_37 = arith.constant 0 : index
      %c0_38 = arith.constant 0 : index
      %c0_39 = arith.constant 0 : index
      %79 = vector.load %arg7[%c0_37, %c0_38, %c0_39] : memref<1x1x32xf32, #tpu.memory_space<vmem>>, vector<1x1x32xf32>
      %80 = vector.shape_cast %79 : vector<1x1x32xf32> to vector<1x32xf32>
      %81 = vector.shape_cast %78 : vector<1x32xf32> to vector<1x1x32xf32>
      tpu.vector_store %arg7[%c0_37, %c0_38, %c0_39], %81 {strides = array<i32>} : memref<1x1x32xf32, #tpu.memory_space<vmem>>, vector<1x1x32xf32>,
    } else {
    }
    return
  }
  func.func @transform_0(%arg0: i32, %arg1: i32) -> (i32, i32) {
    %c0_i32 = arith.constant 0 : i32
    %c0_i32_0 = arith.constant 0 : i32
    %c0_i32_1 = arith.constant 0 : i32
    return %c0_i32, %c0_i32_0 : i32, i32
  }
  func.func @transform_1(%arg0: i32, %arg1: i32) -> (i32, i32) {
    %c0_i32 = arith.constant 0 : i32
    %c0_i32_0 = arith.constant 0 : i32
    return %c0_i32, %arg1 : i32, i32
  }
  func.func @transform_2(%arg0: i32, %arg1: i32) -> (i32, i32) {
    %c0_i32 = arith.constant 0 : i32
    %c0_i32_0 = arith.constant 0 : i32
    return %arg0, %c0_i32 : i32, i32
  }
  func.func @transform_3(%arg0: i32, %arg1: i32) -> (i32, i32) {
    %c0_i32 = arith.constant 0 : i32
    %c0_i32_0 = arith.constant 0 : i32
    return %c0_i32, %arg1 : i32, i32
  }
  func.func @transform_4(%arg0: i32, %arg1: i32) -> (i32, i32) {
    %c0_i32 = arith.constant 0 : i32
    return %arg0, %arg1 : i32, i32
  }
  func.func @transform_5(%arg0: i32, %arg1: i32) -> (i32, i32, i32) {
    %c0_i32 = arith.constant 0 : i32
    %c0_i32_0 = arith.constant 0 : i32
    %c0_i32_1 = arith.constant 0 : i32
    return %arg0, %c0_i32, %c0_i32_0 : i32, i32, i32
  }
}

</mosaic_0001>

<bundles_post_ra>
// kernel: tpu_custom_call.1
= control target key start
LH: loop header
LB: loop body
LE: loop exit
PB: predicated region body
PF: predicated region fallthrough
CT: control target
= control target key end

     0   :  { %11 = vsyncpa [#allocation5], 0  ;;  %s1659_s0 = inlined_call_operand.vmem [shape: f32[128,32], index: 0, kind: input, shape index: {}]   ;;  %s1660_s1 = inlined_call_operand.vmem [shape: f32[1,128], index: 1, kind: input, shape index: {}]   ;;  %s1661_s2 = inlined_call_operand.vmem [shape: f32[128,1], index: 2, kind: input, shape index: {}]   ;;  %s1662_s3 = inlined_call_operand.vmem [shape: s32[1,128], index: 3, kind: input, shape index: {}]   ;;  %s1663_s4 = inlined_call_operand.hbm [shape: f32[128,128], index: 4, kind: output, shape index: {0}]   ;;  %s1664_s5 = inlined_call_operand.hbm [shape: f32[4,1,32], index: 5, kind: output, shape index: {1}]  }
   0x1   :  { %13 = vsyncpa [#allocation5 + $0x1], 0 }
   0x2   :  { %14 = vsyncpa [#allocation7], 0 }
   0x3   :  { %16 = vsyncpa [#allocation7 + $0x1], 0  ;;  %s1303_s18 = smov 0   ;;  %s1305_s19 = smov 0  }
   0x4   :  { %s1307_s20 = smov 0   ;;  %s1309_s21 = smov 0  }
   0x5   :  { %s1311_s22 = smov 0   ;;  %s1313_s23 = smov 0  }
   0x6 LB: > { %s929_s24 = sadd.s32 4294967295, %s1263_s23   ;;  %s930_s25 = sadd.s32 4294967294, %s1263_s23   ;;  %s1263_s23 = sphi %s1313_s23, %s22_s23   ;;  %s1259_s22 = sphi %s1311_s22, %s1677_s22   ;;  %s1255_s21 = sphi %s1309_s21, %s1676_s21   ;;  %s1251_s20 = sphi %s1307_s20, %s1675_s20   ;;  %s1247_s19 = sphi %s1305_s19, %s1674_s19   ;;  %s1243_s18 = sphi %s1303_s18, %s1673_s18  }
   0x7   : > { %s34_s26 = sadd.s32 1, %s1259_s22  ;;  %s142_s27 = sadd.s32 1, %s1251_s20 }
   0x8   : > { %p36_p0 = scmp.ge.s32.totalorder %s34_s26, 4  ;;  %p152_p1 = scmp.ne.s32.totalorder %s1251_s20, %s1247_s19 }
   0x9   : > { %p153_p2 = scmp.eq.s32.totalorder %s929_s24, 3  ;;  %p158_p3 = scmp.ne.s32.totalorder %s1247_s19, %s1243_s18 }
   0xa   : > { %s1679_s26 = smov (%p36_p0, %s34_s26), 0  ;;  %p159_p5 = scmp.eq.s32.totalorder %s930_s25, 3 }
   0xb   : > { %p1343_p4 = por %p153_p2, %p152_p1  ;;  %s137_s29 = ssub.s32 %s1259_s22, %s1679_s26 }
   0xc   : > { %p935_p6 = scmp.ge.s32.totalorder %s1263_s23, 1  ;;  %p140_p7 = scmp.eq.s32.totalorder %s137_s29, 0 }
   0xd   : > { %p1350_p8 = por %p159_p5, %p158_p3  ;;  %p227_p9 = scmp.lt.s32.totalorder %s1263_s23, 5 }
   0xe   : > { %s1356_s6 = scalar_select %p140_p7, %s1251_s20, %s142_s27  }
   0xf   : > { %p228_p10 = pnand %p935_p6, %p227_p9 }
  0x10   : > { %s939_s11 = sshll.u32 (!%p228_p10), %s1255_s21, 5  ;;  %s937_s12 = sshll.u32 (!%p228_p10), %s1255_s21, 2 }
  0x11   : > { %231 = sbr.rel (%p228_p10) target bundleno = 573 (0x23d), region = 36  ;;  %s1373_s15 = scalar_lea.vmem (!%p228_p10), %s1659_s0, %s939_s11 }
  0x12   : > { %p269_p11 = scmp.lt.s32.totalorder (!%p228_p10), %s937_s12, 15  ;;  %s980_s13 = sshll.u32 (!%p228_p10), %s1255_s21, 9 }
  0x13   : > { %s1588_s17 = scalar_lea.hbm (!%p228_p10), %s1663_s4, %s980_s13 }
  0x16   : > { %v301_v0 = vld [vmem:[%s1659_s0 + $0x78] sm:$0xff]  ;;  %vm307_vm0 = vcmask 261120   ;;  %v300_v1 = vld [vmem:[%s1659_s0 + $0x70] sm:$0xff]  ;;  %v1265_v2 = vmov 0   ;;  %v299_v3 = vld [vmem:[%s1659_s0 + $0x68] sm:$0xff]  ;;  %s1681_s12 = smov (!%p269_p11, %s937_s12), 15  ;;  %v519_v56 = vlaneseq  ;;  %v524_v62 = vstv %s939_s11 }
  0x17   : > { %1011 = vmatprep.subr.msk.mxu0 %vm307_vm0, %v301_v0  ;;  %1138 = vset.pattern.permute.xlu1 %v1265_v2  ;;  %v281_v4 = vld [vmem:[%s1373_s15] sm:$0xff]  ;;  %s938_s24 = sshll.u32 %s1681_s12, 3  ;;  %v297_v10 = vld [vmem:[%s1659_s0 + $0x58] sm:$0xff]  ;;  %v296_v11 = vld [vmem:[%s1659_s0 + $0x50] sm:$0xff]  ;;  %v1266_v25 = vmov 0.0   ;;  %vm1267_vm1 = vmmov 0  }
  0x18   : > { %1012 = vmatpush3.xpose.msk.msra.mxu0 %vm307_vm0, %v301_v0  ;;  %1137 = vset.pattern.permute.xlu0 %v1265_v2  ;;  %s272_s29 = scalar_lea.vmem %s1661_s2, %s938_s24  ;;  %v298_v5 = vld [vmem:[%s1659_s0 + $0x60] sm:$0xff]  ;;  %v295_v12 = vld [vmem:[%s1659_s0 + $0x48] sm:$0xff]  ;;  %v293_v14 = vld [vmem:[%s1659_s0 + $0x38] sm:$0xff]  ;;  %v520_v60 = vshrl.u32 %v519_v56, 7 }
  0x19   : > { %1013 = vmatprep.subr.msk.mxu0 %vm307_vm0, %v300_v1  ;;  %1043 = vmatprep.mubr.msk.f32.mxu0 %vm307_vm0, %v281_v4  ;;  %v303_v6 = vld [vmem:[%s272_s29 + $0x8] sm:$0xff]  ;;  %v305_v7 = vld [vmem:[%s272_s29 + $0x18] sm:$0xff]  ;;  %v302_v8 = vld [vmem:[%s272_s29] sm:$0xff] }
  0x1a   : > { %460 = vperm.xlu1 %1138, %v303_v6   ;;  %470 = vperm.xlu0 %1137, %v305_v7   ;;  %v304_v9 = vld [vmem:[%s272_s29 + $0x10] sm:$0xff]  ;;  %v294_v13 = vld [vmem:[%s1659_s0 + $0x40] sm:$0xff]  ;;  %v291_v16 = vld [vmem:[%s1659_s0 + $0x28] sm:$0xff]  ;;  %v523_v61 = vadd.s32 24, %v520_v60  ;;  %v522_v0 = vadd.s32 16, %v520_v60  ;;  %v521_v6 = vadd.s32 8, %v520_v60 }
  0x1b   : > { %v292_v15 = vld [vmem:[%s1659_s0 + $0x30] sm:$0xff]  ;;  %v290_v17 = vld [vmem:[%s1659_s0 + $0x20] sm:$0xff]  ;;  %v289_v18 = vld [vmem:[%s1659_s0 + $0x18] sm:$0xff]  ;;  %1049 = vmatprep.subr.mxu1 %v1266_v25  ;;  %1057 = vmatprep.mubr.msk.f32.mxu1 %vm1267_vm1, %v1266_v25  ;;  %s1269_s29 = smov [#allocation4]  }
  0x1c   : > { %1014 = vmatpush3.xpose.msk.msra.mxu0 %vm307_vm0, %v300_v1  ;;  %v288_v19 = vld [vmem:[%s1659_s0 + $0x10] sm:$0xff]  ;;  %v287_v20 = vld [vmem:[%s1659_s0 + $0x8] sm:$0xff]  ;;  %v286_v21 = vld [vmem:[%s1659_s0] sm:$0xff]  ;;  %v1472_v1 = vadd.s32 %v524_v62, %v523_v61  ;;  %s1161_s7 = sshll.u32 %s1269_s29, 4  ;;  %s1162_s7 = int_to_ptr.vmem [resolvable:$false] %s1161_s7 }
  0x1d   : > { %1015 = vmatprep.subr.msk.mxu0 %vm307_vm0, %v299_v3  ;;  %v282_v22 = vld [vmem:[%s1373_s15 + $0x8] sm:$0xff]  ;;  %v283_v23 = vld [vmem:[%s1373_s15 + $0x10] sm:$0xff]  ;;  %v284_v24 = vld [vmem:[%s1373_s15 + $0x18] sm:$0xff]  ;;  %s1465_s15 = sand.u32 1, %s1247_s19   ;;  %s1163_s8 = scalar_lea.vmem %s1162_s7, 1024 }
  0x1e   : > { %455 = vperm.xlu1 %1138, %v302_v8   ;;  %465 = vperm.xlu0 %1137, %v304_v9   ;;  %v960_v27 = vld [vmem:[%s1660_s1] ss:$0 sm:$0xff]  ;;  %s936_s9 = sshll.u32 %s1465_s15, 5  ;;  %vm558_vm2 = vcmp.lt.s32.totalorder %v1472_v1, 0  ;;  %s770_s25 = scalar_lea.sflag [#allocation5], %s1465_s15 }
  0x1f   : > { %s1474_s10 = scalar_lea.vmem [#allocation4], %s936_s9 }
  0x20   : > { %1016 = vmatpush3.xpose.msk.msra.mxu0 %vm307_vm0, %v299_v3  ;;  %v559_v3 = vsub.s32 0, %v1472_v1  ;;  %s788_s24 = sshll.u32 %s1474_s10, 4  ;;  %s1591_s24 = int_to_ptr.vmem [resolvable:$true] %s788_s24 }
  0x21   : > { %1017 = vmatprep.subr.msk.mxu0 %vm307_vm0, %v298_v5  ;;  %s1157_s27 = scalar_lea.vmem %s1591_s24, 512  ;;  %p1164_p1 = scmp.lt.s32.totalorder %s1591_s24, %s1162_s7 }
  0x22   : > { %v964_v9 = vmin.u32 %v559_v3, %v1472_v1  ;;  %p1158_p12 = scmp.ne.s32.totalorder %s1591_s24, %s1157_s27  ;;  %p1165_p2 = scmp.lt.s32.totalorder %s1163_s8, %s1157_s27 }
  0x24   : > { %1018 = vmatpush3.xpose.msk.msra.mxu0 %vm307_vm0, %v298_v5  ;;  %v1485_v5 = vadd.s32 %v524_v62, %v522_v0  ;;  %p1159_p13 = pnand %p1158_p12, %p1343_p4  ;;  %p1166_p3 = por %p1165_p2, %p1164_p1 }
  0x25   : > { %1019 = vmatprep.subr.msk.mxu0 %vm307_vm0, %v297_v10 }
  0x26   : > { %vm551_vm4 = vcmp.lt.s32.totalorder %v1485_v5, 0  ;;  %p1160_p0 = pneg %p1159_p13 }
  0x28   : > { %1020 = vmatpush3.xpose.msk.msra.mxu0 %vm307_vm0, %v297_v10  ;;  %v552_v10 = vsub.s32 0, %v1485_v5  ;;  %p1167_p5 = pnand %p1166_p3, %p1160_p0 }
  0x29   : > { %1021 = vmatprep.subr.msk.mxu0 %vm307_vm0, %v296_v11 }
  0x2c   : > { %1022 = vmatpush3.xpose.msk.msra.mxu0 %vm307_vm0, %v296_v11 }
  0x2d   : > { %1023 = vmatprep.subr.msk.mxu0 %vm307_vm0, %v295_v12 }
  0x30   : > { %1024 = vmatpush3.xpose.msk.msra.mxu0 %vm307_vm0, %v295_v12  ;;  %v1497_v12 = vadd.s32 %v524_v62, %v521_v6 }
  0x31   : > { %1025 = vmatprep.subr.msk.mxu0 %vm307_vm0, %v294_v13 }
  0x32   : > { %vm544_vm8 = vcmp.lt.s32.totalorder %v1497_v12, 0 }
  0x34   : > { %1026 = vmatpush3.xpose.msk.msra.mxu0 %vm307_vm0, %v294_v13  ;;  %v562_v13 = vand.u32 63, %v964_v9 }
  0x35   : > { %1027 = vmatprep.subr.msk.mxu0 %vm307_vm0, %v293_v14 }
  0x38   : > { %1028 = vmatpush3.xpose.msk.msra.mxu0 %vm307_vm0, %v293_v14  ;;  %v963_v14 = vmin.u32 %v552_v10, %v1485_v5 }
  0x39   : > { %1029 = vmatprep.subr.msk.mxu0 %vm307_vm0, %v292_v15 }
  0x3c   : > { %1030 = vmatpush3.xpose.msk.msra.mxu0 %vm307_vm0, %v292_v15 }
  0x3d   : > { %1031 = vmatprep.subr.msk.mxu0 %vm307_vm0, %v291_v16 }
  0x40   : > { %1032 = vmatpush3.xpose.msk.msra.mxu0 %vm307_vm0, %v291_v16  ;;  %v545_v16 = vsub.s32 0, %v1497_v12 }
  0x41   : > { %1033 = vmatprep.subr.msk.mxu0 %vm307_vm0, %v290_v17 }
  0x44   : > { %1034 = vmatpush3.xpose.msk.msra.mxu0 %vm307_vm0, %v290_v17  ;;  %v1502_v17 = vadd.s32 %v524_v62, %v520_v60 }
  0x45   : > { %1035 = vmatprep.subr.msk.mxu0 %vm307_vm0, %v289_v18 }
  0x46   : > { %vm537_vm13 = vcmp.lt.s32.totalorder %v1502_v17, 0 }
  0x48   : > { %1036 = vmatpush3.xpose.msk.msra.mxu0 %vm307_vm0, %v289_v18  ;;  %v1504_v18 = vand.u32 127, %v519_v56 }
  0x49   : > { %1037 = vmatprep.subr.msk.mxu0 %vm307_vm0, %v288_v19 }
  0x4a   : > { %vm536_vm3 = vcmp.ne.s32.totalorder %v1472_v1, %v1504_v18  ;;  %vm535_vm7 = vcmp.ne.s32.totalorder %v1485_v5, %v1504_v18  ;;  %vm534_vm12 = vcmp.ne.s32.totalorder %v1497_v12, %v1504_v18 }
  0x4c   : > { %1038 = vmatpush3.xpose.msk.msra.mxu0 %vm307_vm0, %v288_v19  ;;  %v563_v19 = vsub.s32 0, %v562_v13 }
  0x4d   : > { %1039 = vmatprep.subr.msk.mxu0 %vm307_vm0, %v287_v20 }
  0x50   : > { %1040 = vmatpush3.xpose.msk.msra.mxu0 %vm307_vm0, %v287_v20  ;;  %v555_v20 = vand.u32 63, %v963_v14 }
  0x51   : > { %1041 = vmatprep.subr.msk.mxu0 %vm307_vm0, %v286_v21 }
  0x54   : > { %1042 = vmatpush3.xpose.msk.msra.mxu0 %vm307_vm0, %v286_v21 }
  0x57   : > { %1044 = vmatmul.mubr.msk.f32.vlgmr.msra.gmra.mxu0 %vm307_vm0, %v282_v22  ;;  %v962_v22 = vmin.u32 %v545_v16, %v1497_v12 }
  0x58   : > { %1046 = vmatprep.mubr.msk.f32.mxu0 %vm307_vm0, %v283_v23  ;;  %v538_v23 = vsub.s32 0, %v1502_v17 }
  0x5b   : > { %1047 = vmatmul.mubr.msk.f32.gmra.mxu0 %vm307_vm0, %v284_v24  ;;  %v564_v24 = vsel %vm558_vm2, %v563_v19, %v562_v13  ;;  %vm533_vm2 = vcmp.ne.s32.totalorder %v1502_v17, %v1504_v18 }
  0x5c   : > { %vm568_vm5 = vcmp.ne.s32.totalorder %v564_v24, 0  ;;  %vm572_vm6 = vcmp.lt.s32.totalorder %v564_v24, 0 }
  0x5d   : > { %vm1521_vm9 = vmand %vm572_vm6, %vm568_vm5 }
  0x95   : > { %v461_v26 = vpop.permute.xlu1 %460  ;;  %v471_v28 = vpop.permute.xlu0 %470 }
  0x96   : > { %v480_v30 = vadd.f32 %v960_v27, %v461_v26  ;;  %v482_v36 = vadd.f32 %v960_v27, %v471_v28  ;;  %v556_v26 = vsub.s32 0, %v555_v20  ;;  %v961_v28 = vmin.u32 %v538_v23, %v1502_v17 }
  0x99   : > { %v456_v29 = vpop.permute.xlu1 %455  ;;  %v466_v38 = vpop.permute.xlu0 %465 }
  0x9a   : > { %v479_v33 = vadd.f32 %v960_v27, %v456_v29  ;;  %v481_v43 = vadd.f32 %v960_v27, %v466_v38  ;;  %v548_v27 = vand.u32 63, %v962_v22 }
 0x117   : > { %v1045_v31 = vpop.f32.mrf.mxu0 }
 0x118   : > { %v484_v32 = vmul.f32 2.0, %v1045_v31  ;;  %v549_v31 = vsub.s32 0, %v548_v27 }
 0x119   : > { %v434_v34 = vpop.f32.mrf.mxu0 }
 0x11a   : > { %v488_v35 = vsub.f32 %v480_v30, %v484_v32  ;;  %v483_v37 = vmul.f32 2.0, %v434_v34  ;;  %v557_v30 = vsel %vm551_vm4, %v556_v26, %v555_v20  ;;  %v541_v32 = vand.u32 63, %v961_v28 }
 0x11b   : > { %v1048_v39 = vpop.f32.mrf.mxu0  ;;  %v580_v34 = vadd.s32 64, %v564_v24  ;;  %vm567_vm10 = vcmp.ne.s32.totalorder %v557_v30, 0  ;;  %vm571_vm11 = vcmp.lt.s32.totalorder %v557_v30, 0 }
 0x11c   : > { %v492_v40 = vmax.f32 %v488_v35, 0.0  ;;  %v487_v41 = vsub.f32 %v479_v33, %v483_v37  ;;  %v486_v42 = vmul.f32 2.0, %v1048_v39  ;;  %v542_v37 = vsub.s32 0, %v541_v32  ;;  %vm1537_vm14 = vmand %vm571_vm11, %vm567_vm10 }
 0x11d   : > { %v444_v44 = vpop.f32.mrf.mxu0  ;;  %v584_v39 = vsel %vm1521_vm9, %v580_v34, %v564_v24 }
 0x11e   : > { %v496_v45 = vmul.f32 -0.5, %v492_v40  ;;  %v491_v46 = vmax.f32 %v487_v41, 0.0  ;;  %v490_v47 = vsub.f32 %v482_v36, %v486_v42  ;;  %v485_v48 = vmul.f32 2.0, %v444_v44  ;;  %v965_v40 = vld [vmem:[%s1662_s3] ss:$0 sm:$0xff] }
 0x11f   : > { %v550_v36 = vsel %vm544_vm8, %v549_v31, %v548_v27  ;;  %v579_v41 = vadd.s32 64, %v557_v30  ;;  %vm593_vm4 = vcmp.eq.s32.totalorder %v584_v39, %v965_v40 }
 0x120   : > { %v501_v49 = vmul.f32 1.442695, %v496_v45  ;;  %v495_v50 = vmul.f32 -0.5, %v491_v46  ;;  %v494_v51 = vmax.f32 %v490_v47, 0.0  ;;  %v489_v52 = vsub.f32 %v481_v43, %v485_v48  ;;  %vm597_vm6 = vmand %vm593_vm4, %vm536_vm3 }
 0x121   : > { %vm566_vm15 = vcmp.ne.s32.totalorder %v550_v36, 0  ;;  %vm570_vm0 = vcmp.lt.s32.totalorder %v550_v36, 0  ;;  %v543_v43 = vsel %vm537_vm13, %v542_v37, %v541_v32  ;;  %v583_v45 = vsel %vm1537_vm14, %v579_v41, %v557_v30 }
 0x122   : > { %1139 = vpow2.f32 %v501_v49  ;;  %v499_v53 = vmul.f32 1.442695, %v495_v50  ;;  %v498_v54 = vmul.f32 -0.5, %v494_v51  ;;  %v493_v55 = vmax.f32 %v489_v52, 0.0  ;;  %vm1549_vm5 = vmand %vm570_vm0, %vm566_vm15 }
 0x123   : > { %v578_v46 = vadd.s32 64, %v550_v36  ;;  %vm565_vm8 = vcmp.ne.s32.totalorder %v543_v43, 0  ;;  %vm569_vm9 = vcmp.lt.s32.totalorder %v543_v43, 0  ;;  %vm592_vm10 = vcmp.eq.s32.totalorder %v583_v45, %v965_v40 }
 0x124   : > { %1141 = vpow2.f32 %v499_v53  ;;  %v505_v57 = vmul.f32 1.442695, %v498_v54  ;;  %v497_v58 = vmul.f32 -0.5, %v493_v55  ;;  %v577_v49 = vadd.s32 64, %v543_v43  ;;  %vm573_vm11 = vmand %vm569_vm9, %vm565_vm8 }
 0x125   : > { %v582_v48 = vsel %vm1549_vm5, %v578_v46, %v550_v36  ;;  %v1268_v50 = vmov 1.0   ;;  %vm750_vm15 = vcmask 253952  }
 0x126   : > { %1143 = vpow2.f32 %v505_v57  ;;  %v503_v59 = vmul.f32 1.442695, %v497_v58  ;;  %vm591_vm13 = vcmp.eq.s32.totalorder %v582_v48, %v965_v40  ;;  %v581_v51 = vsel %vm573_vm11, %v577_v49, %v543_v43  ;;  %751 = vst.msk [vmem:[#allocation2] sm:$0x1] %vm750_vm15, %v1266_v25  ;;  %752 = vst.msk [vmem:[#allocation3] sm:$0x1] %vm750_vm15, %v1266_v25 }
 0x127   : > { %vm595_vm14 = vmand %vm591_vm13, %vm534_vm12 }
 0x128   : > { %1145 = vpow2.f32 %v503_v59 }
 0x12f   : > { %v1470_v63 = vpop.eup %1139 }
 0x130   : > { %508 = vst [vmem:[%s1474_s10 + $0x8] sm:$0xff] %v1470_v63  ;;  %v513_v15 = vmul.f32 1.442695, %v1470_v63 }
 0x131   : > { %v1478_v2 = vpop.eup %1141 }
 0x132   : > { %507 = vst [vmem:[%s1474_s10] sm:$0xff] %v1478_v2  ;;  %v511_v21 = vmul.f32 1.442695, %v1478_v2 }
 0x133   : > { %v1483_v4 = vpop.eup %1143 }
 0x134   : > { %v517_v7 = vmul.f32 1.442695, %v1483_v4  ;;  %510 = vst [vmem:[%s1474_s10 + $0x18] sm:$0xff] %v1483_v4 }
 0x135   : > { %v1490_v8 = vpop.eup %1145 }
 0x136   : > { %v515_v11 = vmul.f32 1.442695, %v1490_v8  ;;  %1147 = vpow2.f32 %v517_v7  ;;  %509 = vst [vmem:[%s1474_s10 + $0x10] sm:$0xff] %v1490_v8 }
 0x138   : > { %1149 = vpow2.f32 %v515_v11 }
 0x139   : > { %1151 = vpow2.f32 %v513_v15 }
 0x13a   : > { %1153 = vpow2.f32 %v511_v21 }
 0x143   : > { %v1148_v29 = vpop.eup %1147 }
 0x144   : > { %1050 = vmatpush3.xpose.msk.msra.mxu1 %vm536_vm3, %v1148_v29  ;;  %vm596_vm3 = vmand %vm592_vm10, %vm535_vm7 }
 0x145   : > { %1051 = vmatprep.subr.mxu1 %v1266_v25  ;;  %v1150_v33 = vpop.eup %1149 }
 0x146   : > { %v1152_v38 = vpop.eup %1151 }
 0x147   : > { %v1154_v44 = vpop.eup %1153 }
 0x148   : > { %1052 = vmatpush3.xpose.msk.msra.mxu1 %vm535_vm7, %v1150_v33 }
 0x149   : > { %1053 = vmatprep.subr.mxu1 %v1266_v25 }
 0x14c   : > { %1054 = vmatpush3.xpose.msk.msra.mxu1 %vm534_vm12, %v1152_v38 }
 0x14d   : > { %1055 = vmatprep.subr.mxu1 %v1266_v25 }
 0x150   : > { %1056 = vmatpush3.xpose.msk.msra.mxu1 %vm533_vm2, %v1154_v44 }
 0x151   : > { %1060 = vmatprep.subr.mxu1 %v1266_v25 }
 0x153   : > { %1058 = vmatmul.mubr.f32.vlgmr.msra.gmra.mxu1 %v1268_v50 }
 0x154   : > { %1061 = vmatpush3.xpose.msk.msra.mxu1 %vm597_vm6, %v1483_v4  ;;  %1068 = vmatprep.mubr.msk.f32.mxu1 %vm1267_vm1, %v1266_v25  ;;  %vm590_vm1 = vcmp.eq.s32.totalorder %v581_v51, %v965_v40 }
 0x155   : > { %1062 = vmatprep.subr.mxu1 %v1266_v25  ;;  %vm594_vm7 = vmand %vm590_vm1, %vm533_vm2 }
 0x158   : > { %1063 = vmatpush3.xpose.msk.msra.mxu1 %vm596_vm3, %v1490_v8 }
 0x159   : > { %1064 = vmatprep.subr.mxu1 %v1266_v25 }
 0x15c   : > { %1065 = vmatpush3.xpose.msk.msra.mxu1 %vm595_vm14, %v1470_v63 }
 0x15d   : > { %1066 = vmatprep.subr.mxu1 %v1266_v25 }
 0x160   : > { %1067 = vmatpush3.xpose.msk.msra.mxu1 %vm594_vm7, %v1478_v2 }
 0x163   : > { %1069 = vmatmul.mubr.f32.vlgmr.msra.gmra.mxu1 %v1268_v50 }
 0x164   : > { %1170 = shalt.err (!%p1167_p5)
}
 0x165   : > { %s1171_s9 = scalar_lea.hbm %s1588_s17, 512  ;;  %s1175_s12 = scalar_lea.hbm %s1663_s4, 2048 }
 0x166   : > { %p1172_p6 = scmp.ne.s32.totalorder %s1588_s17, %s1171_s9  ;;  %p1176_p10 = scmp.lt.s32.totalorder %s1588_s17, %s1663_s4 }
 0x167   : > { %p1177_p11 = scmp.lt.s32.totalorder %s1175_s12, %s1171_s9 }
 0x168   : > { %p1173_p7 = pnand %p1172_p6, %p1343_p4 }
 0x169   : > { %p1178_p12 = por %p1177_p11, %p1176_p10 }
 0x16a   : > { %p1174_p9 = pneg %p1173_p7 }
 0x16c   : > { %p1179_p13 = pnand %p1178_p12, %p1174_p9 }
 0x16e   : > { %1182 = shalt.err (!%p1179_p13)
}
 0x16f   : > { %s1270_s16 = smov 128   ;;  %s1271_s27 = smov 8   ;;  %v753_v25 = vld [vmem:[#allocation2] sm:$0x1]  ;;  %v757_v56 = vld [vmem:[#allocation3] sm:$0x1] }
 0x170   : > { %1071 = dma.vmem_to_hbm [thread:$0]  (%p1343_p4), %s1591_s24, 512, %s1588_s17, %s770_s25, %s1270_s16, %s1270_s16, %s1271_s27  }
 0x171   : > { %s977_s29 = sshll.u32 %s1255_s21, 4  ;;  %s264_s7 = scalar_lea.vmem [#allocation6], %s1465_s15 }
 0x172   : > { %s804_s17 = sshll.u32 %s264_s7, 4  ;;  %s802_s8 = scalar_lea.hbm %s1664_s5, %s977_s29  ;;  %s805_s17 = int_to_ptr.vmem [resolvable:$true] %s804_s17 }
 0x173   : > { %s775_s9 = scalar_lea.sflag [#allocation7], %s1465_s15  ;;  %s1183_s10 = scalar_lea.vmem %s805_s17, 16 }
 0x174   : > { %p1184_p0 = scmp.ne.s32.totalorder %s805_s17, %s1183_s10  ;;  %s1272_s11 = smov [#allocation6]  }
 0x175   : > { %s1187_s21 = sshll.u32 %s1272_s11, 4  ;;  %s1188_s21 = int_to_ptr.vmem [resolvable:$false] %s1187_s21 }
 0x176   : > { %p1185_p1 = pnand %p1184_p0, %p1343_p4  ;;  %s1189_s12 = scalar_lea.vmem %s1188_s21, 32 }
 0x177   : > { %p1190_p3 = scmp.lt.s32.totalorder %s805_s17, %s1188_s21  ;;  %p1191_p5 = scmp.lt.s32.totalorder %s1189_s12, %s1183_s10 }
 0x178   : > { %p1186_p2 = pneg %p1185_p1 }
 0x179   : > { %p1192_p6 = por %p1191_p5, %p1190_p3 }
 0x17b   : > { %p1193_p7 = pnand %p1192_p6, %p1186_p2 }
 0x213   : > { %v668_v52 = vpop.f32.mrf.mxu1 }
 0x214   : > { %v754_v53 = vadd.f32 %v753_v25, %v668_v52 }
 0x215   : > { %v1059_v54 = vpop.f32.mrf.mxu1 }
 0x216   : > { %756 = vst.msk [vmem:[#allocation2] sm:$0x1] %vm750_vm15, %v754_v53 }
 0x21d   : > { %v763_v55 = vld [vmem:[#allocation2] sm:$0x1] }
 0x21e   : > { %1155 = vlog2.f32 %v763_v55 }
 0x223   : > { %v742_v57 = vpop.f32.mrf.mxu1 }
 0x224   : > { %v758_v58 = vadd.f32 %v757_v56, %v742_v57 }
 0x225   : > { %v1070_v59 = vpop.f32.mrf.mxu1 }
 0x226   : > { %759 = vst.msk [vmem:[#allocation3] sm:$0x1] %vm750_vm15, %v758_v58 }
 0x22b   : > { %v1156_v60 = vpop.eup %1155 }
 0x22c   : > { %v765_v61 = vmul.f32 0.6931472, %v1156_v60 }
 0x22d   : > { %v766_v62 = vld [vmem:[#allocation3] sm:$0x1] }
 0x22e   : > { %v767_v63 = vsub.f32 %v765_v61, %v766_v62 }
 0x230   : > { %768 = vst.msk [vmem:[%s264_s7] sm:$0x1] %vm750_vm15, %v767_v63 }
 0x231   : > { %1196 = shalt.err (!%p1193_p7)
}
 0x232   : > { %s1197_s13 = scalar_lea.hbm %s802_s8, 16  ;;  %s1201_s16 = scalar_lea.hbm %s1664_s5, 64 }
 0x233   : > { %p1198_p9 = scmp.ne.s32.totalorder %s802_s8, %s1197_s13  ;;  %p1202_p12 = scmp.lt.s32.totalorder %s802_s8, %s1664_s5 }
 0x234   : > { %p1203_p13 = scmp.lt.s32.totalorder %s1201_s16, %s1197_s13 }
 0x235   : > { %p1199_p10 = pnand %p1198_p9, %p1343_p4 }
 0x236   : > { %p1204_p0 = por %p1203_p13, %p1202_p12 }
 0x237   : > { %p1200_p11 = pneg %p1199_p10 }
 0x239   : > { %p1205_p1 = pnand %p1204_p0, %p1200_p11 }
 0x23b   : > { %1208 = shalt.err (!%p1205_p1)
}
 0x23c   : > { %1072 = dma.vmem_to_hbm [thread:$0]  (%p1343_p4), %s805_s17, 16, %s802_s8, %s775_s9  }
 0x23d PF: > { %p1082_p2 = scmp.ge.s32.totalorder %s1263_s23, 2  ;;  %s816_s7 = sand.u32 1, %s1243_s18  }
 0x23e   : > { %s817_s24 = scalar_lea.sflag [#allocation5], %s816_s7 }
 0x23f   : > { %p1076_p3 = pnand %p1082_p2, %p1350_p8 }
 0x241   : > { %p1077_p5 = pneg %p1076_p3 }
 0x243   : > { %1234 = dma.done.wait (%p1077_p5), %s817_s24, 512  }
 0x244   : > { %1236 = vsyncadd (%p1077_p5), %s817_s24, 4294966784  ;;  %s826_s25 = scalar_lea.sflag [#allocation7], %s816_s7 }
 0x245   : > { %1238 = dma.done.wait (%p1077_p5), %s826_s25, 16  }
 0x246   : > { %1240 = vsyncadd (%p1077_p5), %s826_s25, 4294967280  ;;  %s22_s23 = sadd.s32 1, %s1263_s23   ;;  %s1673_s18 = smov %s1247_s19 }
 0x247   : > { %p19_p6 = scmp.ge.s32.totalorder %s22_s23, 6   ;;  %s1674_s19 = smov %s1251_s20 }
 0x248   : > { %s1675_s20 = smov %s1356_s6  ;;  %s1676_s21 = smov %s1259_s22 }
 0x249   : > { %s1677_s22 = smov %s1679_s26  ;;  %21 = sbr.rel (!%p19_p6) target bundleno = 6 (0x6), region = 104 }
 0x24e   :  { %830 = vsyncpa [#allocation5], 1 }
 0x24f   :  { %832 = vsyncpa [#allocation5 + $0x1], 1 }
 0x250   :  { %833 = vsyncpa [#allocation7], 1 }
 0x251   :  { %835 = vsyncpa [#allocation7 + $0x1], 1 }

</bundles_post_ra>
